<compile_context>
chip_gen: v6e
topology: v6e:2x2x1
jax: 0.10.0
libtpu: 0.0.40
codegen_flags: <defaults>
</compile_context>

<pallas_src>
import jax
import jax.numpy as jnp
from jax.experimental import pallas as pl
from jax.experimental.pallas import tpu as pltpu

LANE = 128           # lane width (last dim of every tile)
ROW_TILE = 512       # sublane rows per tile for large images (multiple of 8)
MAX_TILE_ELEMS = 3 * ROW_TILE * LANE   # ~196K elems -> 768 KiB f32 per buffer


def _adjust_saturation_kernel(factor_ref, x_ref, o_ref):
    # factor_ref: SMEM (1,) f32 scalar-prefetch argument
    # x_ref/o_ref: VMEM block (B_tile, 3, S, 128)
    f = factor_ref[0]
    x = x_ref[...]
    r = x[:, 0]                       # (B_tile, S, 128)
    g = x[:, 1]
    b = x[:, 2]
    gray = 0.2989 * r + 0.587 * g + 0.114 * b
    mix = (1.0 - f) * gray
    o_ref[:, 0] = jnp.clip(f * r + mix, 0.0, 1.0).astype(o_ref.dtype)
    o_ref[:, 1] = jnp.clip(f * g + mix, 0.0, 1.0).astype(o_ref.dtype)
    o_ref[:, 2] = jnp.clip(f * b + mix, 0.0, 1.0).astype(o_ref.dtype)


def adjust_saturation(image: jax.Array, saturation_factor) -> jax.Array:
    """image: (..., C, H, W) float with C in {1, 3}."""
    *lead, c, h, w = image.shape
    if c == 1:
        # torchvision returns single-channel images unchanged
        return image
    if c != 3:
        raise ValueError(f"AdjustSaturation expects 1 or 3 channels, got {c}")

    n = 1
    for d in lead:
        n *= d
    hw = h * w

    # --- choose lane-dense layout (n, 3, rows, 128) and tile sizes ---------
    rows_raw = pl.cdiv(hw, LANE)
    if rows_raw <= ROW_TILE:
        # small image: one row-tile covers the whole (possibly padded) image
        row_tile = rows_raw
        rows = rows_raw
        # pack several batch elements per grid step to amortize step overhead
        per_img_elems = 3 * rows * LANE
        b_cap = max(1, MAX_TILE_ELEMS // per_img_elems)
        b_tile = 1
        for d in range(1, n + 1):
            if n % d == 0 and d <= b_cap:
                b_tile = d
    else:
        # large image: tile the row axis, one image per batch block
        row_tile = ROW_TILE
        rows = pl.cdiv(rows_raw, ROW_TILE) * ROW_TILE
        b_tile = 1
    hw_pad = rows * LANE

    # --- reshape / pad to (n, 3, rows, 128) ---------------------------------
    x = image.reshape(n, 3, hw)
    if hw_pad != hw:
        x = jnp.pad(x, ((0, 0), (0, 0), (0, hw_pad - hw)))
    x = x.reshape(n, 3, rows, LANE)

    factor = jnp.asarray([saturation_factor], dtype=jnp.float32)

    grid = (n // b_tile, rows // row_tile)
    block = (b_tile, 3, row_tile, LANE)

    out = pl.pallas_call(
        _adjust_saturation_kernel,
        out_shape=jax.ShapeDtypeStruct((n, 3, rows, LANE), image.dtype),
        grid_spec=pltpu.PrefetchScalarGridSpec(
            num_scalar_prefetch=1,
            grid=grid,
            in_specs=[pl.BlockSpec(block, lambda i, j, fac: (i, 0, j, 0))],
            out_specs=pl.BlockSpec(block, lambda i, j, fac: (i, 0, j, 0)),
        ),
        compiler_params=pltpu.CompilerParams(
            dimension_semantics=("parallel", "parallel"),
        ),
    )(factor, x)

    out = out.reshape(n, 3, hw_pad)[:, :, :hw]
    return out.reshape(*lead, c, h, w)


class AdjustSaturation:
    """JAX/Pallas equivalent of the PyTorch AdjustSaturation module."""

    def __init__(self, saturation_factor: float):
        self.saturation_factor = float(saturation_factor)

    def __call__(self, image: jax.Array) -> jax.Array:
        return adjust_saturation(image, self.saturation_factor)


def _reference(image: jax.Array, saturation_factor: float) -> jax.Array:
    # pure-JAX reference for a sanity check
    r = image[..., 0:1, :, :]
    g = image[..., 1:2, :, :]
    b = image[..., 2:3, :, :]
    gray = 0.2989 * r + 0.587 * g + 0.114 * b
    f = float(saturation_factor)
    return jnp.clip(f * image + (1.0 - f) * gray, 0.0, 1.0)


if __name__ == "__main__":
    key = jax.random.PRNGKey(0)

    # (N, C, H, W) = (2, 3, 16, 16), values in [0, 1]
    x = jax.random.uniform(key, (2, 3, 16, 16), dtype=jnp.float32)

    module = AdjustSaturation(saturation_factor=2.0)
    y = jax.block_until_ready(module(x))
    y_ref = _reference(x, 2.0)
    assert y.shape == x.shape and y.dtype == x.dtype
    assert jnp.max(jnp.abs(y - y_ref)) < 1e-5

    # factor == 1.0 must reproduce the input exactly
    y_id = jax.block_until_ready(AdjustSaturation(1.0)(x))
    assert jnp.max(jnp.abs(y_id - x)) < 1e-6

    # spatial size not a multiple of 128 exercises the padding/slicing path
    key2 = jax.random.PRNGKey(1)
    x2 = jax.random.uniform(key2, (1, 3, 10, 10), dtype=jnp.float32)
    y2 = jax.block_until_ready(AdjustSaturation(0.5)(x2))
    assert jnp.max(jnp.abs(y2 - _reference(x2, 0.5))) < 1e-5

    # single-channel images pass through unchanged
    x1 = jax.random.uniform(key2, (2, 1, 16, 16), dtype=jnp.float32)
    y1 = jax.block_until_ready(AdjustSaturation(2.0)(x1))
    assert jnp.max(jnp.abs(y1 - x1)) == 0.0

    print("KERNEL_OK")
</pallas_src>

<mosaic_0001>
module attributes {stable_mosaic.version = 11 : i64} {
  func.func @_adjust_saturation_kernel(%arg0: i32, %arg1: i32, %arg2: memref<1xf32, #tpu.memory_space<smem>>, %arg3: memref<2x3x2x128xf32, #tpu.memory_space<vmem>>, %arg4: memref<2x3x2x128xf32, #tpu.memory_space<vmem>>) attributes {dimension_semantics = [#tpu.dimension_semantics<parallel>, #tpu.dimension_semantics<parallel>], iteration_bounds = array<i64: 1, 1>, scalar_prefetch = 1 : i64, scratch_operands = 0 : i64, tpu.core_type = #tpu.core_type<tc>, window_params = [{transform_indices = @transform_0, window_bounds = array<i64: 2, 3, 2, 128>}, {transform_indices = @transform_1, window_bounds = array<i64: 2, 3, 2, 128>}]} {
    %c0 = arith.constant 0 : index
    %0 = memref.load %arg2[%c0] : memref<1xf32, #tpu.memory_space<smem>>
    %c0_0 = arith.constant 0 : index
    %c0_1 = arith.constant 0 : index
    %c0_2 = arith.constant 0 : index
    %c0_3 = arith.constant 0 : index
    %1 = vector.load %arg3[%c0_0, %c0_1, %c0_2, %c0_3] : memref<2x3x2x128xf32, #tpu.memory_space<vmem>>, vector<2x3x2x128xf32>
    %2 = vector.extract_strided_slice %1 {offsets = [0, 0, 0, 0], sizes = [2, 1, 2, 128], strides = [1, 1, 1, 1]} : vector<2x3x2x128xf32> to vector<2x1x2x128xf32>
    %3 = vector.shape_cast %2 : vector<2x1x2x128xf32> to vector<2x2x128xf32>
    %4 = vector.extract_strided_slice %1 {offsets = [0, 1, 0, 0], sizes = [2, 1, 2, 128], strides = [1, 1, 1, 1]} : vector<2x3x2x128xf32> to vector<2x1x2x128xf32>
    %5 = vector.shape_cast %4 : vector<2x1x2x128xf32> to vector<2x2x128xf32>
    %6 = vector.extract_strided_slice %1 {offsets = [0, 2, 0, 0], sizes = [2, 1, 2, 128], strides = [1, 1, 1, 1]} : vector<2x3x2x128xf32> to vector<2x1x2x128xf32>
    %7 = vector.shape_cast %6 : vector<2x1x2x128xf32> to vector<2x2x128xf32>
    %cst = arith.constant 2.989000e-01 : f32
    %8 = vector.broadcast %cst : f32 to vector<2x2x128xf32>
    %9 = arith.mulf %8, %3 : vector<2x2x128xf32>
    %cst_4 = arith.constant 5.870000e-01 : f32
    %10 = vector.broadcast %cst_4 : f32 to vector<2x2x128xf32>
    %11 = arith.mulf %10, %5 : vector<2x2x128xf32>
    %12 = arith.addf %9, %11 : vector<2x2x128xf32>
    %cst_5 = arith.constant 1.140000e-01 : f32
    %13 = vector.broadcast %cst_5 : f32 to vector<2x2x128xf32>
    %14 = arith.mulf %13, %7 : vector<2x2x128xf32>
    %15 = arith.addf %12, %14 : vector<2x2x128xf32>
    %cst_6 = arith.constant 1.000000e+00 : f32
    %16 = arith.subf %cst_6, %0 : f32
    %17 = vector.broadcast %16 : f32 to vector<2x2x128xf32>
    %18 = arith.mulf %17, %15 : vector<2x2x128xf32>
    %19 = vector.broadcast %0 : f32 to vector<2x2x128xf32>
    %20 = arith.mulf %19, %3 : vector<2x2x128xf32>
    %21 = arith.addf %20, %18 : vector<2x2x128xf32>
    %cst_7 = arith.constant 0.000000e+00 : f32
    %cst_8 = arith.constant 1.000000e+00 : f32
    %22 = vector.broadcast %cst_7 : f32 to vector<2x2x128xf32>
    %23 = arith.maximumf %22, %21 : vector<2x2x128xf32>
    %24 = vector.broadcast %cst_8 : f32 to vector<2x2x128xf32>
    %25 = arith.minimumf %24, %23 : vector<2x2x128xf32>
    %c0_9 = arith.constant 0 : index
    %c0_10 = arith.constant 0 : index
    %c0_11 = arith.constant 0 : index
    %c0_12 = arith.constant 0 : index
    %26 = vector.load %arg4[%c0_9, %c0_10, %c0_11, %c0_12] : memref<2x3x2x128xf32, #tpu.memory_space<vmem>>, vector<2x1x2x128xf32>
    %27 = vector.shape_cast %26 : vector<2x1x2x128xf32> to vector<2x2x128xf32>
    %28 = vector.shape_cast %25 : vector<2x2x128xf32> to vector<2x1x2x128xf32>
    tpu.vector_store %arg4[%c0_9, %c0_10, %c0_11, %c0_12], %28 {strides = array<i32>} : memref<2x3x2x128xf32, #tpu.memory_space<vmem>>, vector<2x1x2x128xf32>,
    %29 = vector.broadcast %0 : f32 to vector<2x2x128xf32>
    %30 = arith.mulf %29, %5 : vector<2x2x128xf32>
    %31 = arith.addf %30, %18 : vector<2x2x128xf32>
    %cst_13 = arith.constant 0.000000e+00 : f32
    %cst_14 = arith.constant 1.000000e+00 : f32
    %32 = vector.broadcast %cst_13 : f32 to vector<2x2x128xf32>
    %33 = arith.maximumf %32, %31 : vector<2x2x128xf32>
    %34 = vector.broadcast %cst_14 : f32 to vector<2x2x128xf32>
    %35 = arith.minimumf %34, %33 : vector<2x2x128xf32>
    %c0_15 = arith.constant 0 : index
    %c1 = arith.constant 1 : index
    %c0_16 = arith.constant 0 : index
    %c0_17 = arith.constant 0 : index
    %36 = vector.load %arg4[%c0_15, %c1, %c0_16, %c0_17] : memref<2x3x2x128xf32, #tpu.memory_space<vmem>>, vector<2x1x2x128xf32>
    %37 = vector.shape_cast %36 : vector<2x1x2x128xf32> to vector<2x2x128xf32>
    %38 = vector.shape_cast %35 : vector<2x2x128xf32> to vector<2x1x2x128xf32>
    tpu.vector_store %arg4[%c0_15, %c1, %c0_16, %c0_17], %38 {strides = array<i32>} : memref<2x3x2x128xf32, #tpu.memory_space<vmem>>, vector<2x1x2x128xf32>,
    %39 = vector.broadcast %0 : f32 to vector<2x2x128xf32>
    %40 = arith.mulf %39, %7 : vector<2x2x128xf32>
    %41 = arith.addf %40, %18 : vector<2x2x128xf32>
    %cst_18 = arith.constant 0.000000e+00 : f32
    %cst_19 = arith.constant 1.000000e+00 : f32
    %42 = vector.broadcast %cst_18 : f32 to vector<2x2x128xf32>
    %43 = arith.maximumf %42, %41 : vector<2x2x128xf32>
    %44 = vector.broadcast %cst_19 : f32 to vector<2x2x128xf32>
    %45 = arith.minimumf %44, %43 : vector<2x2x128xf32>
    %c0_20 = arith.constant 0 : index
    %c2 = arith.constant 2 : index
    %c0_21 = arith.constant 0 : index
    %c0_22 = arith.constant 0 : index
    %46 = vector.load %arg4[%c0_20, %c2, %c0_21, %c0_22] : memref<2x3x2x128xf32, #tpu.memory_space<vmem>>, vector<2x1x2x128xf32>
    %47 = vector.shape_cast %46 : vector<2x1x2x128xf32> to vector<2x2x128xf32>
    %48 = vector.shape_cast %45 : vector<2x2x128xf32> to vector<2x1x2x128xf32>
    tpu.vector_store %arg4[%c0_20, %c2, %c0_21, %c0_22], %48 {strides = array<i32>} : memref<2x3x2x128xf32, #tpu.memory_space<vmem>>, vector<2x1x2x128xf32>,
    return
  }
  func.func @transform_0(%arg0: i32, %arg1: i32, %arg2: memref<1xf32, #tpu.memory_space<smem>>) -> (i32, i32, i32, i32) {
    %c0_i32 = arith.constant 0 : i32
    %c0_i32_0 = arith.constant 0 : i32
    %c0_i32_1 = arith.constant 0 : i32
    return %arg0, %c0_i32, %arg1, %c0_i32_0 : i32, i32, i32, i32
  }
  func.func @transform_1(%arg0: i32, %arg1: i32, %arg2: memref<1xf32, #tpu.memory_space<smem>>) -> (i32, i32, i32, i32) {
    %c0_i32 = arith.constant 0 : i32
    %c0_i32_0 = arith.constant 0 : i32
    %c0_i32_1 = arith.constant 0 : i32
    return %arg0, %c0_i32, %arg1, %c0_i32_0 : i32, i32, i32, i32
  }
}

</mosaic_0001>

<bundles_post_ra>
// kernel: tpu_custom_call.1
= control target key start
LH: loop header
LB: loop body
LE: loop exit
PB: predicated region body
PF: predicated region fallthrough
CT: control target
= control target key end

     0   :  { %8 = vsyncpa [#allocation5], 0  ;;  %s181_s0 = inlined_call_operand.<no memory space> [shape: f32[1], index: 0, kind: input, shape index: {}]   ;;  %s182_s1 = inlined_call_operand.hbm [shape: f32[2,3,2,128], index: 1, kind: input, shape index: {}]   ;;  %s183_s2 = inlined_call_operand.hbm [shape: f32[2,3,2,128], index: 2, kind: output, shape index: {}]  }
   0x1   :  { %9 = vsyncpa [#allocation6], 0  ;;  %s144_s9 = smov [#allocation4]  }
   0x2   :  { %s15_s10 = sshll.u32 %s144_s9, 4  ;;  %s16_s10 = int_to_ptr.vmem [resolvable:$true] %s15_s10 }
   0x3   :  { %s108_s11 = scalar_lea.vmem %s16_s10, 192  ;;  %p113_p1 = scmp.lt.s32.totalorder %s16_s10, %s16_s10 }
   0x4   :  { %p109_p0 = scmp.ne.s32.totalorder %s16_s10, %s108_s11  ;;  %p114_p2 = scmp.lt.s32.totalorder %s108_s11, %s108_s11 }
   0x6   :  { %p115_p3 = por %p114_p2, %p113_p1 }
   0x8   :  { %p116_p4 = pnand %p115_p3, %p109_p0 }
   0xa   :  { %119 = shalt.err (!%p116_p4)
}
   0xb   :  { %s145_s12 = smov 32   ;;  %s146_s13 = smov 2  }
   0xc   :  { %21 = dma.hbm_to_vmem [thread:$0]  %s182_s1, 192, %s16_s10, [#allocation5], %s145_s12, %s145_s12, %s146_s13  }
   0xd   :  { %140 = dma.done.wait [#allocation5], 192  }
   0xe   :  { %141 = vsyncadd [#allocation5], 4294967104  ;;  %s42_s18 = ssub.f32 1.0, %s181_s0  ;;  %v26_v0 = vld [vmem:[#allocation4] sm:$0x3]  ;;  %v46_v6 = vstv %s181_s0  ;;  %s147_s0 = smov [#allocation7]  }
   0xf   :  { %v27_v1 = vld [vmem:[#allocation4 + $0x2] sm:$0x3]  ;;  %v28_v2 = vld [vmem:[#allocation4 + $0x4] sm:$0x3]  ;;  %v32_v3 = vmul.f32 0.2989, %v26_v0  ;;  %v47_v15 = vmul.f32 %v46_v6, %v26_v0 }
  0x10   :  { %v34_v4 = vmul.f32 0.587, %v27_v1  ;;  %v38_v5 = vmul.f32 0.114, %v28_v2  ;;  %v29_v7 = vld [vmem:[#allocation4 + $0x6] sm:$0x3]  ;;  %v43_v14 = vstv %s42_s18  ;;  %v57_v18 = vmul.f32 %v46_v6, %v27_v1 }
  0x11   :  { %v30_v8 = vld [vmem:[#allocation4 + $0x8] sm:$0x3]  ;;  %v31_v9 = vld [vmem:[#allocation4 + $0xa] sm:$0x3]  ;;  %v33_v11 = vmul.f32 0.2989, %v29_v7  ;;  %v68_v19 = vmul.f32 %v46_v6, %v28_v2  ;;  %v48_v22 = vmul.f32 %v46_v6, %v29_v7 }
  0x12   :  { %v36_v10 = vadd.f32 %v34_v4, %v32_v3  ;;  %v35_v12 = vmul.f32 0.587, %v30_v8  ;;  %v39_v13 = vmul.f32 0.114, %v31_v9  ;;  %v58_v23 = vmul.f32 %v46_v6, %v30_v8  ;;  %s84_s1 = sshll.u32 %s147_s0, 4  ;;  %s85_s1 = int_to_ptr.vmem [resolvable:$true] %s84_s1 }
  0x13   :  { %v69_v24 = vmul.f32 %v46_v6, %v31_v9  ;;  %s120_s21 = scalar_lea.vmem %s85_s1, 192  ;;  %p125_p6 = scmp.lt.s32.totalorder %s85_s1, %s85_s1 }
  0x14   :  { %v40_v16 = vadd.f32 %v38_v5, %v36_v10  ;;  %v37_v17 = vadd.f32 %v35_v12, %v33_v11  ;;  %p121_p5 = scmp.ne.s32.totalorder %s85_s1, %s120_s21  ;;  %p126_p7 = scmp.lt.s32.totalorder %s120_s21, %s120_s21 }
  0x16   :  { %v44_v20 = vmul.f32 %v43_v14, %v40_v16  ;;  %v41_v21 = vadd.f32 %v39_v13, %v37_v17  ;;  %p127_p8 = por %p126_p7, %p125_p6 }
  0x18   :  { %v49_v25 = vadd.f32 %v47_v15, %v44_v20  ;;  %v45_v26 = vmul.f32 %v43_v14, %v41_v21  ;;  %v59_v27 = vadd.f32 %v57_v18, %v44_v20  ;;  %v70_v28 = vadd.f32 %v68_v19, %v44_v20  ;;  %p128_p9 = pnand %p127_p8, %p121_p5 }
  0x1a   :  { %v51_v29 = vmax.f32 %v49_v25, 0.0  ;;  %v50_v30 = vadd.f32 %v48_v22, %v45_v26  ;;  %v61_v31 = vmax.f32 %v59_v27, 0.0  ;;  %v60_v32 = vadd.f32 %v58_v23, %v45_v26 }
  0x1b   :  { %v72_v33 = vmax.f32 %v70_v28, 0.0  ;;  %v71_v34 = vadd.f32 %v69_v24, %v45_v26 }
  0x1c   :  { %v53_v35 = vmin.f32 %v51_v29, 1.0  ;;  %v52_v36 = vmax.f32 %v50_v30, 0.0  ;;  %v63_v37 = vmin.f32 %v61_v31, 1.0  ;;  %v62_v38 = vmax.f32 %v60_v32, 0.0 }
  0x1d   :  { %v74_v39 = vmin.f32 %v72_v33, 1.0  ;;  %v73_v40 = vmax.f32 %v71_v34, 0.0 }
  0x1e   :  { %55 = vst [vmem:[#allocation7] sm:$0x3] %v53_v35  ;;  %v54_v41 = vmin.f32 %v52_v36, 1.0  ;;  %66 = vst [vmem:[#allocation7 + $0x2] sm:$0x3] %v63_v37  ;;  %v64_v42 = vmin.f32 %v62_v38, 1.0 }
  0x1f   :  { %77 = vst [vmem:[#allocation7 + $0x4] sm:$0x3] %v74_v39  ;;  %v75_v43 = vmin.f32 %v73_v40, 1.0 }
  0x20   :  { %56 = vst [vmem:[#allocation7 + $0x6] sm:$0x3] %v54_v41  ;;  %67 = vst [vmem:[#allocation7 + $0x8] sm:$0x3] %v64_v42 }
  0x21   :  { %78 = vst [vmem:[#allocation7 + $0xa] sm:$0x3] %v75_v43 }
  0x22   :  { %131 = shalt.err (!%p128_p9)
}
  0x23   :  { %90 = dma.vmem_to_hbm [thread:$0]  %s85_s1, 192, %s183_s2, [#allocation6], %s145_s12, %s145_s12, %s146_s13  }
  0x24   :  { %142 = dma.done.wait [#allocation6], 192  }
  0x25   :  { %143 = vsyncadd [#allocation6], 4294967104 }
  0x26   :  { %94 = vsyncpa [#allocation5], 1 }
  0x27   :  { %95 = vsyncpa [#allocation6], 1 }

</bundles_post_ra>
